<compile_context>
chip_gen: v7x
topology: tpu7x:2x2x1
jax: 0.10.0
libtpu: 0.0.40
codegen_flags: <defaults>
</compile_context>

<pallas_src>
import functools

import jax
import jax.numpy as jnp
from jax.experimental import pallas as pl
from jax.experimental.pallas import tpu as pltpu


def _rbm_cdk_kernel(vT_ref, wcol_ref, hnoise_ref, vnoise_ref, vout_ref, *, k):
    v0 = vT_ref[...]                         # (B, N)  -- N on lanes
    w_col = wcol_ref[...]                    # (B, 1)
    B, N = v0.shape

    # Hoisted once: JAX does not CSE broadcast_in_dim inside the unrolled loop.
    w_b = jnp.broadcast_to(w_col, (B, N))    # (B, N)

    def sample(p, noise):
        # relu(sign(p - noise)) == 1.0 where p > noise else 0.0 (tie -> 0)
        return jnp.where(p > noise, 1.0, 0.0)

    def v_to_h(v, noise):
        # F.linear(v, W): per-column dot over B -> (1, N) (sublane reduce, stays off MXU)
        p_h = jax.nn.sigmoid(jnp.sum(v * w_b, axis=0, keepdims=True))
        return sample(p_h, noise)            # (1, N)

    def h_to_v(h, noise):
        # F.linear(h, W.t()): outer-product broadcast -> (B, N)
        p_v = jax.nn.sigmoid(h * w_b)
        return sample(p_v, noise)            # (B, N)

    h_ = v_to_h(v0, hnoise_ref[0])           # (1, N)
    v_ = v0
    for step in range(k):                    # k is small & static -> unrolled
        v_ = h_to_v(h_, vnoise_ref[step])
        h_ = v_to_h(v_, hnoise_ref[step + 1])
    vout_ref[...] = v_.astype(vout_ref.dtype)


@functools.partial(jax.jit, static_argnums=(2,))
def rbm_forward(v, W, k, key=None):
    """Returns (v, v_) exactly like RBM.forward.

    v: (N, B) float32, W: (1, B) float32, k: static int, key: PRNG key for the
    Gaussian noise (pass a fresh key per call to mimic randn_like per forward).
    """
    N, B = v.shape
    assert W.shape == (1, B)
    if key is None:
        key = jax.random.PRNGKey(0)
    k_h, k_v = jax.random.split(key)

    # Batched noise: (k+1) draws for the h-samples, k draws for the v-samples,
    # already in the transposed (lane-dense) layout the kernel uses.
    h_noise = jax.random.normal(k_h, (k + 1, 1, N), dtype=jnp.float32)
    v_noise = jax.random.normal(k_v, (max(k, 1), B, N), dtype=jnp.float32)

    vT = v.T                                  # (B, N): B on sublanes, N on lanes
    w_col = W.T                               # (B, 1)

    kern = functools.partial(_rbm_cdk_kernel, k=k)
    v_out_T = pl.pallas_call(
        kern,
        out_shape=jax.ShapeDtypeStruct((B, N), v.dtype),
        in_specs=[
            pl.BlockSpec(memory_space=pltpu.MemorySpace.VMEM),  # vT
            pl.BlockSpec(memory_space=pltpu.MemorySpace.VMEM),  # W column
            pl.BlockSpec(memory_space=pltpu.MemorySpace.VMEM),  # h noise (k+1, 1, N)
            pl.BlockSpec(memory_space=pltpu.MemorySpace.VMEM),  # v noise (k, B, N)
        ],
        out_specs=pl.BlockSpec(memory_space=pltpu.MemorySpace.VMEM),
    )(vT, w_col, h_noise, v_noise)
    return v, v_out_T.T                       # back to (N, B)


if __name__ == "__main__":
    # Module hyper-params (small, consistent with forward's shape requirements):
    n_vis, n_hid, k, batch = 16, 32, 2, 8

    key = jax.random.PRNGKey(0)
    k_w, k_v, k_noise = jax.random.split(key, 3)

    # Deterministic parameter init (matches __init__ shapes):
    W = jax.random.normal(k_w, (1, batch), dtype=jnp.float32) * 0.01
    v_bias = jnp.zeros((n_vis,), jnp.float32)   # unused in forward (as in source)
    h_bias = jnp.zeros((n_hid,), jnp.float32)   # unused in forward (as in source)

    # Input v: F.linear(v, W) requires v's last dim == batch.
    v = (jax.random.uniform(k_v, (n_vis, batch)) > 0.5).astype(jnp.float32)

    v_in, v_out = rbm_forward(v, W, k, key=k_noise)
    jax.block_until_ready(v_out)

    assert v_in.shape == (n_vis, batch)
    assert v_out.shape == (n_vis, batch)
    # Samples are binary {0,1} by construction:
    assert bool(jnp.all((v_out == 0.0) | (v_out == 1.0)))

    print("KERNEL_OK")
</pallas_src>

<mosaic_0001>
module attributes {stable_mosaic.version = 11 : i64} {
  func.func @_rbm_cdk_kernel(%arg0: memref<8x16xf32, #tpu.memory_space<vmem>>, %arg1: memref<8x1xf32, #tpu.memory_space<vmem>>, %arg2: memref<3x1x16xf32, #tpu.memory_space<vmem>>, %arg3: memref<2x8x16xf32, #tpu.memory_space<vmem>>, %arg4: memref<8x16xf32, #tpu.memory_space<vmem>>) attributes {dimension_semantics = [], scalar_prefetch = 0 : i64, scratch_operands = 0 : i64, tpu.core_type = #tpu.core_type<tc>} {
    %c0 = arith.constant 0 : index
    %c0_0 = arith.constant 0 : index
    %0 = vector.load %arg0[%c0, %c0_0] : memref<8x16xf32, #tpu.memory_space<vmem>>, vector<8x16xf32>
    %c0_1 = arith.constant 0 : index
    %c0_2 = arith.constant 0 : index
    %1 = vector.load %arg1[%c0_1, %c0_2] : memref<8x1xf32, #tpu.memory_space<vmem>>, vector<8x1xf32>
    %2 = vector.shape_cast %1 : vector<8x1xf32> to vector<8x1xf32>
    %3 = vector.broadcast %2 : vector<8x1xf32> to vector<8x16xf32>
    %c0_3 = arith.constant 0 : index
    %c0_4 = arith.constant 0 : index
    %c0_5 = arith.constant 0 : index
    %4 = vector.load %arg2[%c0_3, %c0_4, %c0_5] : memref<3x1x16xf32, #tpu.memory_space<vmem>>, vector<1x1x16xf32>
    %5 = vector.shape_cast %4 : vector<1x1x16xf32> to vector<1x16xf32>
    %6 = arith.mulf %0, %3 : vector<8x16xf32>
    %cst = arith.constant dense<0.000000e+00> : vector<16xf32>
    %7 = vector.multi_reduction <add>, %6, %cst [0] : vector<8x16xf32> to vector<16xf32>
    %8 = vector.shape_cast %7 : vector<16xf32> to vector<1x16xf32>
    %9 = arith.negf %8 : vector<1x16xf32>
    %10 = math.exp %9 : vector<1x16xf32>
    %cst_6 = arith.constant 1.000000e+00 : f32
    %11 = vector.broadcast %cst_6 : f32 to vector<1x16xf32>
    %12 = arith.addf %11, %10 : vector<1x16xf32>
    %13 = arith.divf %11, %12 : vector<1x16xf32>
    %14 = arith.cmpf ogt, %13, %5 : vector<1x16xf32>
    %cst_7 = arith.constant 1.000000e+00 : f32
    %cst_8 = arith.constant 0.000000e+00 : f32
    %15 = vector.broadcast %cst_7 : f32 to vector<1x16xf32>
    %16 = vector.broadcast %cst_8 : f32 to vector<1x16xf32>
    %17 = arith.select %14, %15, %16 : vector<1x16xi1>, vector<1x16xf32>
    %c0_9 = arith.constant 0 : index
    %c0_10 = arith.constant 0 : index
    %c0_11 = arith.constant 0 : index
    %18 = vector.load %arg3[%c0_9, %c0_10, %c0_11] : memref<2x8x16xf32, #tpu.memory_space<vmem>>, vector<1x8x16xf32>
    %19 = vector.shape_cast %18 : vector<1x8x16xf32> to vector<8x16xf32>
    %20 = vector.broadcast %17 : vector<1x16xf32> to vector<8x16xf32>
    %21 = arith.mulf %20, %3 : vector<8x16xf32>
    %22 = arith.negf %21 : vector<8x16xf32>
    %23 = math.exp %22 : vector<8x16xf32>
    %cst_12 = arith.constant 1.000000e+00 : f32
    %24 = vector.broadcast %cst_12 : f32 to vector<8x16xf32>
    %25 = arith.addf %24, %23 : vector<8x16xf32>
    %26 = arith.divf %24, %25 : vector<8x16xf32>
    %27 = arith.cmpf ogt, %26, %19 : vector<8x16xf32>
    %cst_13 = arith.constant 1.000000e+00 : f32
    %cst_14 = arith.constant 0.000000e+00 : f32
    %28 = vector.broadcast %cst_13 : f32 to vector<8x16xf32>
    %29 = vector.broadcast %cst_14 : f32 to vector<8x16xf32>
    %30 = arith.select %27, %28, %29 : vector<8x16xi1>, vector<8x16xf32>
    %c1 = arith.constant 1 : index
    %c0_15 = arith.constant 0 : index
    %c0_16 = arith.constant 0 : index
    %31 = vector.load %arg2[%c1, %c0_15, %c0_16] : memref<3x1x16xf32, #tpu.memory_space<vmem>>, vector<1x1x16xf32>
    %32 = vector.shape_cast %31 : vector<1x1x16xf32> to vector<1x16xf32>
    %33 = arith.mulf %30, %3 : vector<8x16xf32>
    %cst_17 = arith.constant dense<0.000000e+00> : vector<16xf32>
    %34 = vector.multi_reduction <add>, %33, %cst_17 [0] : vector<8x16xf32> to vector<16xf32>
    %35 = vector.shape_cast %34 : vector<16xf32> to vector<1x16xf32>
    %36 = arith.negf %35 : vector<1x16xf32>
    %37 = math.exp %36 : vector<1x16xf32>
    %cst_18 = arith.constant 1.000000e+00 : f32
    %38 = vector.broadcast %cst_18 : f32 to vector<1x16xf32>
    %39 = arith.addf %38, %37 : vector<1x16xf32>
    %40 = arith.divf %38, %39 : vector<1x16xf32>
    %41 = arith.cmpf ogt, %40, %32 : vector<1x16xf32>
    %cst_19 = arith.constant 1.000000e+00 : f32
    %cst_20 = arith.constant 0.000000e+00 : f32
    %42 = vector.broadcast %cst_19 : f32 to vector<1x16xf32>
    %43 = vector.broadcast %cst_20 : f32 to vector<1x16xf32>
    %44 = arith.select %41, %42, %43 : vector<1x16xi1>, vector<1x16xf32>
    %c1_21 = arith.constant 1 : index
    %c0_22 = arith.constant 0 : index
    %c0_23 = arith.constant 0 : index
    %45 = vector.load %arg3[%c1_21, %c0_22, %c0_23] : memref<2x8x16xf32, #tpu.memory_space<vmem>>, vector<1x8x16xf32>
    %46 = vector.shape_cast %45 : vector<1x8x16xf32> to vector<8x16xf32>
    %47 = vector.broadcast %44 : vector<1x16xf32> to vector<8x16xf32>
    %48 = arith.mulf %47, %3 : vector<8x16xf32>
    %49 = arith.negf %48 : vector<8x16xf32>
    %50 = math.exp %49 : vector<8x16xf32>
    %cst_24 = arith.constant 1.000000e+00 : f32
    %51 = vector.broadcast %cst_24 : f32 to vector<8x16xf32>
    %52 = arith.addf %51, %50 : vector<8x16xf32>
    %53 = arith.divf %51, %52 : vector<8x16xf32>
    %54 = arith.cmpf ogt, %53, %46 : vector<8x16xf32>
    %cst_25 = arith.constant 1.000000e+00 : f32
    %cst_26 = arith.constant 0.000000e+00 : f32
    %55 = vector.broadcast %cst_25 : f32 to vector<8x16xf32>
    %56 = vector.broadcast %cst_26 : f32 to vector<8x16xf32>
    %57 = arith.select %54, %55, %56 : vector<8x16xi1>, vector<8x16xf32>
    %c0_27 = arith.constant 0 : index
    %c0_28 = arith.constant 0 : index
    %58 = vector.load %arg4[%c0_27, %c0_28] : memref<8x16xf32, #tpu.memory_space<vmem>>, vector<8x16xf32>
    tpu.vector_store %arg4[%c0_27, %c0_28], %57 {strides = array<i32>} : memref<8x16xf32, #tpu.memory_space<vmem>>, vector<8x16xf32>,
    return
  }
}

</mosaic_0001>

<bundles_post_ra>
// kernel: rbm_forward.3
= control target key start
LH: loop header
LB: loop body
LE: loop exit
PB: predicated region body
PF: predicated region fallthrough
CT: control target
= control target key end

     0   :  { %v155_v1 = vmov 0   ;;  %s216_s0 = inlined_call_operand.vmem [shape: f32[8,16], index: 0, kind: input, shape index: {}]   ;;  %s217_s1 = inlined_call_operand.vmem [shape: f32[8,1], index: 1, kind: input, shape index: {}]   ;;  %s218_s2 = inlined_call_operand.vmem [shape: f32[3,1,16], index: 2, kind: input, shape index: {}]   ;;  %s219_s3 = inlined_call_operand.vmem [shape: f32[2,8,16], index: 3, kind: input, shape index: {}]   ;;  %s220_s4 = inlined_call_operand.hbm [shape: f32[8,16], index: 4, kind: output, shape index: {}]  }
   0x1   :  { %v19_v0 = vld [vmem:[%s217_s1] sm:$0xff]  ;;  %114 = vset.pattern.permute.xlu0 %v155_v1 }
   0x2   :  { %22 = vperm.xlu0 %114, %v19_v0  }
   0x3   :  { %9 = vsyncpa [#allocation3], 0  ;;  %v18_v2 = vld [vmem:[%s216_s0] sm:$0xff]  ;;  %vm27_vm0 = vcmask 130048   ;;  %v44_v15 = vlaneseq  ;;  %v156_v20 = vmov 0.0   ;;  %v109_v49 = vld [vmem:[%s219_s3 + $0x8] sm:$0xff] }
   0x4   :  { %v25_v17 = vld [vmem:[%s218_s2] sm:$0x1]  ;;  %v107_v41 = vld [vmem:[%s218_s2 + $0x1] sm:$0x1]  ;;  %s157_s25 = smov [#allocation2]  }
   0x5   :  { %v45_v16 = vshrl.u32 %v44_v15, 7  ;;  %v43_v27 = vld [vmem:[%s219_s3] sm:$0xff]  ;;  %s97_s26 = sshll.u32 %s157_s25, 4  ;;  %s98_s26 = int_to_ptr.vmem [resolvable:$true] %s97_s26 }
   0x6   :  { %s131_s2 = scalar_lea.vmem %s98_s26, 128  ;;  %p136_p1 = scmp.lt.s32.totalorder %s98_s26, %s98_s26 }
   0x7   :  { %v46_v18 = vsub.s32 0, %v45_v16  ;;  %p132_p0 = scmp.ne.s32.totalorder %s98_s26, %s131_s2  ;;  %p137_p2 = scmp.lt.s32.totalorder %s131_s2, %s131_s2 }
   0x9   :  { %p138_p3 = por %p137_p2, %p136_p1 }
   0xb   :  { %p139_p4 = pnand %p138_p3, %p132_p0 }
  0x81   :  { %v23_v3 = vpop.permute.xlu0 %22 }
  0x82   :  { %v26_v4 = vmul.f32 %v23_v3, %v18_v2 }
  0x84   :  { %v28_v5 = vsel %vm27_vm0, %v26_v4, 0.0 }
  0x85   :  { %v29_v6 = vrot.slane %v28_v5, 4 }
  0x87   :  { %v30_v7 = vadd.f32 %v29_v6, %v28_v5 }
  0x89   :  { %v31_v8 = vrot.slane %v30_v7, 2 }
  0x8b   :  { %v32_v9 = vadd.f32 %v31_v8, %v30_v7 }
  0x8d   :  { %v33_v10 = vrot.slane %v32_v9, 1 }
  0x8f   :  { %v34_v11 = vadd.f32 %v33_v10, %v32_v9 }
  0x91   :  { %v105_v12 = vmul.f32 -1.442695, %v34_v11 }
  0x93   :  { %115 = vpow2.f32 %v105_v12 }
  0x9d   :  { %v116_v13 = vpop.eup %115 }
  0x9e   :  { %v38_v14 = vadd.f32 1.0, %v116_v13 }
  0xa0   :  { %117 = vrcp.f32 %v38_v14 }
  0xaa   :  { %v118_v19 = vpop.eup %117 }
  0xab   :  { %vm41_vm1 = vcmp.gt.f32.partialorder %v118_v19, %v25_v17 }
  0xac   :  { %v42_v21 = vsel %vm41_vm1, 1.0, %v156_v20 }
  0xad   :  { %v47_v22 = vrot.slane %v42_v21, %v46_v18 }
  0xaf   :  { %v48_v23 = vmul.f32 %v47_v22, %v23_v3 }
  0xb1   :  { %v106_v24 = vmul.f32 -1.442695, %v48_v23 }
  0xb3   :  { %119 = vpow2.f32 %v106_v24 }
  0xbd   :  { %v120_v25 = vpop.eup %119 }
  0xbe   :  { %v52_v26 = vadd.f32 1.0, %v120_v25 }
  0xc0   :  { %121 = vrcp.f32 %v52_v26 }
  0xca   :  { %v122_v28 = vpop.eup %121 }
  0xcb   :  { %vm55_vm2 = vcmp.gt.f32.partialorder %v122_v28, %v43_v27 }
  0xcc   :  { %v56_v29 = vsel %vm55_vm2, 1.0, %v156_v20 }
  0xcd   :  { %v59_v30 = vmul.f32 %v56_v29, %v23_v3 }
  0xcf   :  { %v60_v31 = vsel %vm27_vm0, %v59_v30, 0.0 }
  0xd0   :  { %v61_v32 = vrot.slane %v60_v31, 4 }
  0xd2   :  { %v62_v33 = vadd.f32 %v61_v32, %v60_v31 }
  0xd4   :  { %v63_v34 = vrot.slane %v62_v33, 2 }
  0xd6   :  { %v64_v35 = vadd.f32 %v63_v34, %v62_v33 }
  0xd8   :  { %v65_v36 = vrot.slane %v64_v35, 1 }
  0xda   :  { %v66_v37 = vadd.f32 %v65_v36, %v64_v35 }
  0xdc   :  { %v108_v38 = vmul.f32 -1.442695, %v66_v37 }
  0xde   :  { %123 = vpow2.f32 %v108_v38 }
  0xe8   :  { %v124_v39 = vpop.eup %123 }
  0xe9   :  { %v70_v40 = vadd.f32 1.0, %v124_v39 }
  0xeb   :  { %125 = vrcp.f32 %v70_v40 }
  0xf5   :  { %v126_v42 = vpop.eup %125 }
  0xf6   :  { %vm73_vm3 = vcmp.gt.f32.partialorder %v126_v42, %v107_v41 }
  0xf7   :  { %v74_v43 = vsel %vm73_vm3, 1.0, %v156_v20 }
  0xf8   :  { %v80_v44 = vrot.slane %v74_v43, %v46_v18 }
  0xfa   :  { %v81_v45 = vmul.f32 %v80_v44, %v23_v3 }
  0xfc   :  { %v110_v46 = vmul.f32 -1.442695, %v81_v45 }
  0xfe   :  { %127 = vpow2.f32 %v110_v46 }
 0x108   :  { %v128_v47 = vpop.eup %127 }
 0x109   :  { %v85_v48 = vadd.f32 1.0, %v128_v47 }
 0x10b   :  { %129 = vrcp.f32 %v85_v48 }
 0x115   :  { %v130_v50 = vpop.eup %129 }
 0x116   :  { %vm88_vm4 = vcmp.gt.f32.partialorder %v130_v50, %v109_v49 }
 0x117   :  { %v89_v51 = vsel %vm88_vm4, 1.0, %v156_v20 }
 0x118   :  { %90 = vst.msk [vmem:[#allocation2] sm:$0xff] %vm27_vm0, %v89_v51 }
 0x119   :  { %142 = shalt.err (!%p139_p4)
}
 0x11a   :  { %s143_s29 = scalar_lea.hbm %s220_s4, 128 }
 0x11b   :  { %p144_p5 = scmp.ne.s32.totalorder %s220_s4, %s143_s29  ;;  %p147_p6 = scmp.lt.u32.totalorder %s143_s29, %s220_s4 }
 0x11d   :  { %p149_p7 = pnand %p147_p6, %p144_p5 }
 0x11f   :  { %152 = shalt.err (!%p149_p7)
}
 0x120   :  { %100 = dma.vmem_to_hbm [thread:$0]  %s98_s26, 128, %s220_s4, [#allocation3]  }
 0x121   :  { %153 = dma.done.wait [#allocation3], 128  }
 0x122   :  { %154 = vsyncadd [#allocation3], 4294967168 }
 0x123   :  { %104 = vsyncpa [#allocation3], 1 }

</bundles_post_ra>
